<compile_context>
chip_gen: v7x
topology: tpu7x:2x2x1
jax: 0.10.0
libtpu: 0.0.40
codegen_flags: <defaults>
</compile_context>

<pallas_src>
import jax
import jax.numpy as jnp
from jax.experimental import pallas as pl
from jax.experimental.pallas import tpu as pltpu


def _index_decoder_kernel(x_ref, w1_ref, b1_ref, w2_ref, b2_ref, w3_ref, b3_ref, o_ref):
    # x_ref : (C_in,  TP)  f32  pixel tile  (pixels on the lane axis)
    # w1_ref: (128, C_in)  bf16   b1_ref: (128, 1)  f32
    # w2_ref: (256, 128)   bf16   b2_ref: (256, 1)  f32
    # w3_ref: (C_out, 256) bf16   b3_ref: (C_out, 1) f32
    # o_ref : (C_out, TP)  f32  lane-dense output tile
    x = x_ref[...].astype(jnp.bfloat16)

    h1 = jnp.dot(w1_ref[...], x, preferred_element_type=jnp.float32) + b1_ref[...]
    h1 = jnp.maximum(h1, 0.0).astype(jnp.bfloat16)

    h2 = jnp.dot(w2_ref[...], h1, preferred_element_type=jnp.float32) + b2_ref[...]
    h2 = jnp.maximum(h2, 0.0).astype(jnp.bfloat16)

    o_ref[...] = (
        jnp.dot(w3_ref[...], h2, preferred_element_type=jnp.float32) + b3_ref[...]
    ).astype(o_ref.dtype)


def _round_up(x, m):
    return ((x + m - 1) // m) * m


def index_decoder_forward(x_nchw, params, *, tp=1024):
    """Fused forward pass of IndexDecoder.

    x_nchw: (B, C_in, H, W) float32
    params: dict with w1 (C_in,128), b1 (128,), w2 (128,256), b2 (256,),
            w3 (256,C_out), b3 (C_out,)
    tp:     pixel-tile size (lane axis), rounded to a multiple of 128.
    returns: (B, C_out, H, W) float32
    """
    B, C_in, H, W = x_nchw.shape
    C_out = params["w3"].shape[1]
    P = H * W

    # Native NCHW: flatten the spatial dims only (free reshape, no transpose).
    x = x_nchw.reshape(B, C_in, P).astype(jnp.float32)

    # Pick the pixel tile: multiple of 128 (lane width), capped at the padded
    # pixel count.  If there is only one batch element, keep >= 2 pixel tiles
    # so both megacore TensorCores get work on the "parallel" pixel axis.
    p_pad128 = _round_up(P, 128)
    tp_eff = min(max(tp, 128), p_pad128)
    if B == 1 and p_pad128 >= 256:
        tp_eff = min(tp_eff, _round_up(p_pad128 // 2, 128))
    tp_eff = max((tp_eff // 128) * 128, 128)

    P_pad = _round_up(P, tp_eff)
    if P_pad != P:
        x = jnp.pad(x, ((0, 0), (0, 0), (0, P_pad - P)))

    # Weights transposed to (out, in) so the kernel computes W @ x with
    # channels on sublanes.  bf16 operands for the MXU; biases stay f32.
    w1 = params["w1"].T.astype(jnp.bfloat16)              # (128, C_in)
    b1 = params["b1"].reshape(-1, 1).astype(jnp.float32)   # (128, 1)
    w2 = params["w2"].T.astype(jnp.bfloat16)              # (256, 128)
    b2 = params["b2"].reshape(-1, 1).astype(jnp.float32)   # (256, 1)
    w3 = params["w3"].T.astype(jnp.bfloat16)              # (C_out, 256)
    b3 = params["b3"].reshape(-1, 1).astype(jnp.float32)   # (C_out, 1)

    grid = (B, P_pad // tp_eff)

    flops = 2 * B * P_pad * (C_in * 128 + 128 * 256 + 256 * C_out)
    bytes_accessed = (
        B * C_in * P_pad * 4                               # input read
        + B * C_out * P_pad * 4                            # output write
        + (C_in * 128 + 128 * 256 + 256 * C_out) * 2       # bf16 weights
        + (128 + 256 + C_out) * 4                          # f32 biases
    )

    out = pl.pallas_call(
        _index_decoder_kernel,
        out_shape=jax.ShapeDtypeStruct((B, C_out, P_pad), jnp.float32),
        grid_spec=pltpu.PrefetchScalarGridSpec(
            num_scalar_prefetch=0,
            grid=grid,
            in_specs=[
                # x: one batch element, full channel axis, TP pixels (lane-dense)
                pl.BlockSpec((None, C_in, tp_eff), lambda b, p: (b, 0, p)),
                # Weights/biases: full arrays, constant block -> resident in VMEM
                pl.BlockSpec(w1.shape, lambda b, p: (0, 0)),
                pl.BlockSpec(b1.shape, lambda b, p: (0, 0)),
                pl.BlockSpec(w2.shape, lambda b, p: (0, 0)),
                pl.BlockSpec(b2.shape, lambda b, p: (0, 0)),
                pl.BlockSpec(w3.shape, lambda b, p: (0, 0)),
                pl.BlockSpec(b3.shape, lambda b, p: (0, 0)),
            ],
            out_specs=pl.BlockSpec((None, C_out, tp_eff), lambda b, p: (b, 0, p)),
        ),
        compiler_params=pltpu.CompilerParams(
            dimension_semantics=("parallel", "parallel"),
        ),
        cost_estimate=pl.CostEstimate(
            flops=flops, transcendentals=0, bytes_accessed=bytes_accessed
        ),
    )(x, w1, b1, w2, b2, w3, b3)

    # Drop pixel padding and restore the spatial dims (still NCHW -- no transpose).
    out = out[:, :, :P].reshape(B, C_out, H, W)
    return out


def init_params(key, input_channels, output_channels):
    """Deterministic init matching the Conv2d(k=1) parameter shapes.

    PyTorch stores conv weights as (C_out, C_in, 1, 1); we store the
    transposed matmul form (C_in, C_out)."""
    k1, k2, k3, k4, k5, k6 = jax.random.split(key, 6)

    def uinit(k, shape, fan_in):
        bound = 1.0 / jnp.sqrt(fan_in)
        return jax.random.uniform(k, shape, jnp.float32, -bound, bound)

    return {
        "w1": uinit(k1, (input_channels, 128), input_channels),
        "b1": uinit(k2, (128,), input_channels),
        "w2": uinit(k3, (128, 256), 128),
        "b2": uinit(k4, (256,), 128),
        "w3": uinit(k5, (256, output_channels), 256),
        "b3": uinit(k6, (output_channels,), 256),
    }


def _reference_forward(x_nchw, params):
    """Plain-JAX f32 reference (mirrors the PyTorch module exactly)."""
    B, C_in, H, W = x_nchw.shape
    x = jnp.transpose(x_nchw, (0, 2, 3, 1)).reshape(-1, C_in)
    h = jnp.maximum(x @ params["w1"] + params["b1"], 0.0)
    h = jnp.maximum(h @ params["w2"] + params["b2"], 0.0)
    y = h @ params["w3"] + params["b3"]
    C_out = params["w3"].shape[1]
    return y.reshape(B, H, W, C_out).transpose(0, 3, 1, 2)


if __name__ == "__main__":
    key = jax.random.PRNGKey(0)
    k_x, k_p = jax.random.split(key)

    B, C_in, H, W = 2, 4, 16, 16
    C_out = 8

    x = jax.random.normal(k_x, (B, C_in, H, W), jnp.float32)
    params = init_params(k_p, C_in, C_out)

    out = index_decoder_forward(x, params)
    out = jax.block_until_ready(out)

    ref = _reference_forward(x, params)
    assert out.shape == (B, C_out, H, W), out.shape
    # bf16 MXU operands with f32 accumulation -> loosened tolerance vs f32 ref.
    max_err = float(jnp.max(jnp.abs(out - ref)))
    assert jnp.allclose(out, ref, atol=3e-2, rtol=3e-2), max_err

    print("KERNEL_OK")
</pallas_src>

<mosaic_0001>
module attributes {stable_mosaic.version = 11 : i64} {
  func.func @_index_decoder_kernel(%arg0: i32, %arg1: i32, %arg2: memref<1x4x256xf32, #tpu.memory_space<vmem>>, %arg3: memref<128x4xbf16, #tpu.memory_space<vmem>>, %arg4: memref<128x1xf32, #tpu.memory_space<vmem>>, %arg5: memref<256x128xbf16, #tpu.memory_space<vmem>>, %arg6: memref<256x1xf32, #tpu.memory_space<vmem>>, %arg7: memref<8x256xbf16, #tpu.memory_space<vmem>>, %arg8: memref<8x1xf32, #tpu.memory_space<vmem>>, %arg9: memref<1x8x256xf32, #tpu.memory_space<vmem>>) attributes {dimension_semantics = [#tpu.dimension_semantics<parallel>, #tpu.dimension_semantics<parallel>], iteration_bounds = array<i64: 2, 1>, scalar_prefetch = 0 : i64, scratch_operands = 0 : i64, tpu.core_type = #tpu.core_type<tc>, window_params = [{transform_indices = @transform_0, window_bounds = array<i64: 1, 4, 256>}, {pipeline_mode = #tpu.pipeline_mode<synchronous>, transform_indices = @transform_1, window_bounds = array<i64: 128, 4>}, {pipeline_mode = #tpu.pipeline_mode<synchronous>, transform_indices = @transform_2, window_bounds = array<i64: 128, 1>}, {pipeline_mode = #tpu.pipeline_mode<synchronous>, transform_indices = @transform_3, window_bounds = array<i64: 256, 128>}, {pipeline_mode = #tpu.pipeline_mode<synchronous>, transform_indices = @transform_4, window_bounds = array<i64: 256, 1>}, {pipeline_mode = #tpu.pipeline_mode<synchronous>, transform_indices = @transform_5, window_bounds = array<i64: 8, 256>}, {pipeline_mode = #tpu.pipeline_mode<synchronous>, transform_indices = @transform_6, window_bounds = array<i64: 8, 1>}, {transform_indices = @transform_7, window_bounds = array<i64: 1, 8, 256>}]} {
    %c0 = arith.constant 0 : index
    %c0_0 = arith.constant 0 : index
    %c0_1 = arith.constant 0 : index
    %0 = vector.load %arg2[%c0, %c0_0, %c0_1] : memref<1x4x256xf32, #tpu.memory_space<vmem>>, vector<1x4x256xf32>
    %1 = vector.shape_cast %0 : vector<1x4x256xf32> to vector<4x256xf32>
    %2 = arith.truncf %1 : vector<4x256xf32> to vector<4x256xbf16>
    %c0_2 = arith.constant 0 : index
    %c0_3 = arith.constant 0 : index
    %3 = vector.load %arg3[%c0_2, %c0_3] : memref<128x4xbf16, #tpu.memory_space<vmem>>, vector<128x4xbf16>
    %cst = arith.constant dense<0.000000e+00> : vector<128x256xf32>
    %4 = tpu.matmul %3, %2, %cst {dimension_numbers = #tpu.dot_dimension_numbers<[1], [0], [0], [1], [0, 0, 1, 1], [], []>} : vector<128x4xbf16>, vector<4x256xbf16>, vector<128x256xf32> -> vector<128x256xf32>
    %c0_4 = arith.constant 0 : index
    %c0_5 = arith.constant 0 : index
    %5 = vector.load %arg4[%c0_4, %c0_5] : memref<128x1xf32, #tpu.memory_space<vmem>>, vector<128x1xf32>
    %6 = vector.broadcast %5 : vector<128x1xf32> to vector<128x256xf32>
    %7 = arith.addf %4, %6 : vector<128x256xf32>
    %cst_6 = arith.constant 0.000000e+00 : f32
    %8 = vector.broadcast %cst_6 : f32 to vector<128x256xf32>
    %9 = arith.maximumf %7, %8 : vector<128x256xf32>
    %10 = arith.truncf %9 : vector<128x256xf32> to vector<128x256xbf16>
    %c0_7 = arith.constant 0 : index
    %c0_8 = arith.constant 0 : index
    %11 = vector.load %arg5[%c0_7, %c0_8] : memref<256x128xbf16, #tpu.memory_space<vmem>>, vector<256x128xbf16>
    %cst_9 = arith.constant dense<0.000000e+00> : vector<256x256xf32>
    %12 = tpu.matmul %11, %10, %cst_9 {dimension_numbers = #tpu.dot_dimension_numbers<[1], [0], [0], [1], [0, 0, 1, 1], [], []>} : vector<256x128xbf16>, vector<128x256xbf16>, vector<256x256xf32> -> vector<256x256xf32>
    %c0_10 = arith.constant 0 : index
    %c0_11 = arith.constant 0 : index
    %13 = vector.load %arg6[%c0_10, %c0_11] : memref<256x1xf32, #tpu.memory_space<vmem>>, vector<256x1xf32>
    %14 = vector.broadcast %13 : vector<256x1xf32> to vector<256x256xf32>
    %15 = arith.addf %12, %14 : vector<256x256xf32>
    %cst_12 = arith.constant 0.000000e+00 : f32
    %16 = vector.broadcast %cst_12 : f32 to vector<256x256xf32>
    %17 = arith.maximumf %15, %16 : vector<256x256xf32>
    %18 = arith.truncf %17 : vector<256x256xf32> to vector<256x256xbf16>
    %c0_13 = arith.constant 0 : index
    %c0_14 = arith.constant 0 : index
    %19 = vector.load %arg7[%c0_13, %c0_14] : memref<8x256xbf16, #tpu.memory_space<vmem>>, vector<8x256xbf16>
    %cst_15 = arith.constant dense<0.000000e+00> : vector<8x256xf32>
    %20 = tpu.matmul %19, %18, %cst_15 {dimension_numbers = #tpu.dot_dimension_numbers<[1], [0], [0], [1], [0, 0, 1, 1], [], []>} : vector<8x256xbf16>, vector<256x256xbf16>, vector<8x256xf32> -> vector<8x256xf32>
    %c0_16 = arith.constant 0 : index
    %c0_17 = arith.constant 0 : index
    %21 = vector.load %arg8[%c0_16, %c0_17] : memref<8x1xf32, #tpu.memory_space<vmem>>, vector<8x1xf32>
    %22 = vector.broadcast %21 : vector<8x1xf32> to vector<8x256xf32>
    %23 = arith.addf %20, %22 : vector<8x256xf32>
    %c0_18 = arith.constant 0 : index
    %c0_19 = arith.constant 0 : index
    %c0_20 = arith.constant 0 : index
    %24 = vector.load %arg9[%c0_18, %c0_19, %c0_20] : memref<1x8x256xf32, #tpu.memory_space<vmem>>, vector<1x8x256xf32>
    %25 = vector.shape_cast %24 : vector<1x8x256xf32> to vector<8x256xf32>
    %26 = vector.shape_cast %23 : vector<8x256xf32> to vector<1x8x256xf32>
    tpu.vector_store %arg9[%c0_18, %c0_19, %c0_20], %26 {strides = array<i32>} : memref<1x8x256xf32, #tpu.memory_space<vmem>>, vector<1x8x256xf32>,
    return
  }
  func.func @transform_0(%arg0: i32, %arg1: i32) -> (i32, i32, i32) {
    %c0_i32 = arith.constant 0 : i32
    %c0_i32_0 = arith.constant 0 : i32
    return %arg0, %c0_i32, %arg1 : i32, i32, i32
  }
  func.func @transform_1(%arg0: i32, %arg1: i32) -> (i32, i32) {
    %c0_i32 = arith.constant 0 : i32
    %c0_i32_0 = arith.constant 0 : i32
    %c0_i32_1 = arith.constant 0 : i32
    return %c0_i32, %c0_i32_0 : i32, i32
  }
  func.func @transform_2(%arg0: i32, %arg1: i32) -> (i32, i32) {
    %c0_i32 = arith.constant 0 : i32
    %c0_i32_0 = arith.constant 0 : i32
    %c0_i32_1 = arith.constant 0 : i32
    return %c0_i32, %c0_i32_0 : i32, i32
  }
  func.func @transform_3(%arg0: i32, %arg1: i32) -> (i32, i32) {
    %c0_i32 = arith.constant 0 : i32
    %c0_i32_0 = arith.constant 0 : i32
    %c0_i32_1 = arith.constant 0 : i32
    return %c0_i32, %c0_i32_0 : i32, i32
  }
  func.func @transform_4(%arg0: i32, %arg1: i32) -> (i32, i32) {
    %c0_i32 = arith.constant 0 : i32
    %c0_i32_0 = arith.constant 0 : i32
    %c0_i32_1 = arith.constant 0 : i32
    return %c0_i32, %c0_i32_0 : i32, i32
  }
  func.func @transform_5(%arg0: i32, %arg1: i32) -> (i32, i32) {
    %c0_i32 = arith.constant 0 : i32
    %c0_i32_0 = arith.constant 0 : i32
    %c0_i32_1 = arith.constant 0 : i32
    return %c0_i32, %c0_i32_0 : i32, i32
  }
  func.func @transform_6(%arg0: i32, %arg1: i32) -> (i32, i32) {
    %c0_i32 = arith.constant 0 : i32
    %c0_i32_0 = arith.constant 0 : i32
    %c0_i32_1 = arith.constant 0 : i32
    return %c0_i32, %c0_i32_0 : i32, i32
  }
  func.func @transform_7(%arg0: i32, %arg1: i32) -> (i32, i32, i32) {
    %c0_i32 = arith.constant 0 : i32
    %c0_i32_0 = arith.constant 0 : i32
    return %arg0, %c0_i32, %arg1 : i32, i32, i32
  }
}

</mosaic_0001>

<bundles_post_ra>
// kernel: tpu_custom_call.1
= control target key start
LH: loop header
LB: loop body
LE: loop exit
PB: predicated region body
PF: predicated region fallthrough
CT: control target
= control target key end

     0   :  { %12 = vsyncpa [#allocation3], 0  ;;  %s2050_s0 = inlined_call_operand.vmem [shape: f32[2,4,256], index: 0, kind: input, shape index: {}]   ;;  %s2051_s1 = inlined_call_operand.vmem [shape: bf16[128,4], index: 1, kind: input, shape index: {}]   ;;  %s2052_s2 = inlined_call_operand.vmem [shape: f32[128,1], index: 2, kind: input, shape index: {}]   ;;  %s2053_s3 = inlined_call_operand.vmem [shape: bf16[256,128], index: 3, kind: input, shape index: {}]   ;;  %s2054_s4 = inlined_call_operand.vmem [shape: f32[256,1], index: 4, kind: input, shape index: {}]   ;;  %s2055_s5 = inlined_call_operand.vmem [shape: bf16[8,256], index: 5, kind: input, shape index: {}]   ;;  %s2056_s6 = inlined_call_operand.vmem [shape: f32[8,1], index: 6, kind: input, shape index: {}]   ;;  %s2057_s7 = inlined_call_operand.hbm [shape: f32[2,8,256], index: 7, kind: output, shape index: {}]  }
   0x1   :  { %14 = vsyncpa [#allocation3 + $0x1], 0  ;;  %s1676_s24 = smov 0   ;;  %s1678_s25 = smov 0  }
   0x2   :  { %s1680_s26 = smov 0   ;;  %s1682_s27 = smov 0  }
   0x3   :  { %s1684_s28 = smov 0   ;;  %s1686_s29 = smov 0  }
   0x4 LB: > { %s1419_s30 = sadd.s32 4294967295, %s1632_s29   ;;  %s1420_s8 = sadd.s32 4294967294, %s1632_s29   ;;  %s1632_s29 = sphi %s1686_s29, %s20_s29   ;;  %s1628_s28 = sphi %s1684_s28, %s2064_s28   ;;  %s1624_s27 = sphi %s1682_s27, %s2063_s27   ;;  %s1620_s26 = sphi %s1680_s26, %s2062_s26   ;;  %s1616_s25 = sphi %s1678_s25, %s2061_s25   ;;  %s1612_s24 = sphi %s1676_s24, %s2060_s24  }
   0x5   : > { %s32_s9 = sadd.s32 1, %s1628_s28  ;;  %s195_s10 = sadd.s32 1, %s1620_s26 }
   0x6   : > { %p34_p0 = scmp.ge.s32.totalorder %s32_s9, 2  ;;  %p205_p1 = scmp.ne.s32.totalorder %s1620_s26, %s1616_s25 }
   0x7   : > { %p206_p2 = scmp.eq.s32.totalorder %s1419_s30, 1  ;;  %p211_p3 = scmp.ne.s32.totalorder %s1616_s25, %s1612_s24 }
   0x8   : > { %s2066_s9 = smov (%p34_p0, %s32_s9), 0  ;;  %p212_p5 = scmp.eq.s32.totalorder %s1420_s8, 1 }
   0x9   : > { %p1716_p4 = por %p206_p2, %p205_p1  ;;  %s190_s12 = ssub.s32 %s1628_s28, %s2066_s9 }
   0xa   : > { %p1423_p6 = scmp.ge.s32.totalorder %s1632_s29, 1  ;;  %p193_p7 = scmp.eq.s32.totalorder %s190_s12, 0 }
   0xb   : > { %p1723_p8 = por %p212_p5, %p211_p3  ;;  %p261_p9 = scmp.lt.s32.totalorder %s1632_s29, 3 }
   0xc   : > { %s1729_s14 = scalar_select %p193_p7, %s1620_s26, %s195_s10  }
   0xd   : > { %p262_p10 = pnand %p1423_p6, %p261_p9 }
   0xe   : > { %p298_p11 = scmp.lt.s32.totalorder (!%p262_p10), %s1624_s27, 1  ;;  %v1634_v0 = vmov (!%p262_p10), 0   ;;  %v331_v1 = vld [vmem:[%s2052_s2] sm:$0xff] (!%p262_p10)  ;;  %v332_v2 = vld [vmem:[%s2052_s2 + $0x8] sm:$0xff] (!%p262_p10)  ;;  %v333_v3 = vld [vmem:[%s2052_s2 + $0x10] sm:$0xff] (!%p262_p10)  ;;  %vm492_vm0 = vcmask (!%p262_p10), 1041408  }
   0xf   : > { %265 = sbr.rel (%p262_p10) target bundleno = 890 (0x37a), region = 48  ;;  %531 = vmatprep.mubr.bf16.mxu0 (!%p262_p10), %v1634_v0  ;;  %1525 = vset.pattern.permute.xlu0 (!%p262_p10), %v1634_v0  ;;  %v334_v5 = vld [vmem:[%s2052_s2 + $0x18] sm:$0xff] (!%p262_p10)  ;;  %v335_v8 = vld [vmem:[%s2052_s2 + $0x20] sm:$0xff] (!%p262_p10)  ;;  %v336_v11 = vld [vmem:[%s2052_s2 + $0x28] sm:$0xff] (!%p262_p10)  ;;  %vm467_vm1 = vcmask (!%p262_p10), 31744   ;;  %s1468_s12 = sshll.u32 (!%p262_p10), %s1624_s27, 8 }
  0x10   : > { %1526 = vset.pattern.permute.xlu1 (!%p262_p10), %v1634_v0  ;;  %1012 = vmatprep.mubr.bf16.mxu1 (!%p262_p10), %v1634_v0  ;;  %v1528_v12 = vld [vmem:[%s2051_s1] sm:$0xff] (!%p262_p10)   ;;  %v337_v13 = vld [vmem:[%s2052_s2 + $0x30] sm:$0xff] (!%p262_p10)  ;;  %v338_v14 = vld [vmem:[%s2052_s2 + $0x38] sm:$0xff] (!%p262_p10)  ;;  %s1635_s21 = smov (!%p262_p10), [#allocation2]  }
  0x11   : > { %349 = vperm.xlu0 (!%p262_p10), %1525, %v331_v1   ;;  %359 = vperm.xlu1 (!%p262_p10), %1526, %v333_v3   ;;  %v339_v15 = vld [vmem:[%s2052_s2 + $0x40] sm:$0xff] (!%p262_p10)  ;;  %v340_v16 = vld [vmem:[%s2052_s2 + $0x48] sm:$0xff] (!%p262_p10)  ;;  %v341_v18 = vld [vmem:[%s2052_s2 + $0x50] sm:$0xff] (!%p262_p10)  ;;  %s1558_s22 = sshll.u32 (!%p262_p10), %s1635_s21, 4  ;;  %s1559_s22 = int_to_ptr.vmem [resolvable:$false] %s1558_s22 }
  0x12   : > { %v1529_v17 = vld [vmem:[%s2051_s1 + $0x8] sm:$0xff] (!%p262_p10)   ;;  %v342_v19 = vld [vmem:[%s2052_s2 + $0x58] sm:$0xff] (!%p262_p10)  ;;  %v343_v20 = vld [vmem:[%s2052_s2 + $0x60] sm:$0xff] (!%p262_p10)  ;;  %s1560_s23 = scalar_lea.vmem (!%p262_p10), %s1559_s22, 512 }
  0x13   : > { %v344_v21 = vld [vmem:[%s2052_s2 + $0x68] sm:$0xff] (!%p262_p10)  ;;  %v1530_v22 = vld [vmem:[%s2051_s1 + $0x10] sm:$0xff] (!%p262_p10)   ;;  %v346_v24 = vld [vmem:[%s2052_s2 + $0x78] sm:$0xff] (!%p262_p10) }
  0x14   : > { %v345_v23 = vld [vmem:[%s2052_s2 + $0x70] sm:$0xff] (!%p262_p10)  ;;  %v692_v25 = vld [vmem:[%s2054_s4] sm:$0xff] (!%p262_p10)  ;;  %v693_v26 = vld [vmem:[%s2054_s4 + $0x8] sm:$0xff] (!%p262_p10) }
  0x15   : > { %354 = vperm.xlu0 (!%p262_p10), %1525, %v332_v2   ;;  %364 = vperm.xlu1 (!%p262_p10), %1526, %v334_v5   ;;  %v1531_v27 = vld [vmem:[%s2051_s1 + $0x18] sm:$0xff] (!%p262_p10)   ;;  %v694_v28 = vld [vmem:[%s2054_s4 + $0x10] sm:$0xff] (!%p262_p10)  ;;  %v696_v30 = vld [vmem:[%s2054_s4 + $0x20] sm:$0xff] (!%p262_p10) }
  0x16   : > { %s299_s15 = scalar_select %p298_p11, %s1624_s27, 1  ;;  %v695_v29 = vld [vmem:[%s2054_s4 + $0x18] sm:$0xff]  ;;  %v697_v31 = vld [vmem:[%s2054_s4 + $0x28] sm:$0xff]  ;;  %v1532_v32 = vld [vmem:[%s2051_s1 + $0x20] sm:$0xff]  }
  0x17   : > { %v698_v33 = vld [vmem:[%s2054_s4 + $0x30] sm:$0xff]  ;;  %v699_v34 = vld [vmem:[%s2054_s4 + $0x38] sm:$0xff]  ;;  %v700_v35 = vld [vmem:[%s2054_s4 + $0x40] sm:$0xff] }
  0x18   : > { %s1467_s18 = sshll.u32 %s299_s15, 3  ;;  %v701_v36 = vld [vmem:[%s2054_s4 + $0x48] sm:$0xff]  ;;  %v702_v38 = vld [vmem:[%s2054_s4 + $0x50] sm:$0xff]  ;;  %v703_v39 = vld [vmem:[%s2054_s4 + $0x58] sm:$0xff] }
  0x19   : > { %s305_s8 = scalar_lea.vmem %s2050_s0, %s1467_s18  ;;  %369 = vperm.xlu0 %1525, %v335_v8   ;;  %374 = vperm.xlu1 %1526, %v336_v11   ;;  %v1533_v37 = vld [vmem:[%s2051_s1 + $0x28] sm:$0xff]   ;;  %v704_v40 = vld [vmem:[%s2054_s4 + $0x60] sm:$0xff]  ;;  %v1534_v42 = vld [vmem:[%s2051_s1 + $0x30] sm:$0xff]   ;;  %s2003_s18 = scalar_lea.hbm %s2057_s7, %s1468_s12 }
  0x1a   : > { %v309_v4 = vld [vmem:[%s305_s8] sm:$0xff]  ;;  %v705_v41 = vld [vmem:[%s2054_s4 + $0x68] sm:$0xff]  ;;  %v706_v43 = vld [vmem:[%s2054_s4 + $0x70] sm:$0xff]  ;;  %s294_s8 = sand.u32 1, %s1616_s25  }
  0x1b   : > { %v311_v6 = vcombine.high %v309_v4, %v309_v4  ;;  %v313_v7 = vpack.c.bf16 %v309_v4, %v309_v4  ;;  %v707_v44 = vld [vmem:[%s2054_s4 + $0x78] sm:$0xff]  ;;  %v708_v45 = vld [vmem:[%s2054_s4 + $0x80] sm:$0xff]  ;;  %v709_v46 = vld [vmem:[%s2054_s4 + $0x88] sm:$0xff]  ;;  %s1424_s10 = sshll.u32 %s294_s8, 4  ;;  %s1327_s27 = scalar_lea.sflag [#allocation3], %s294_s8 }
  0x1c   : > { %v1535_v47 = vld [vmem:[%s2051_s1 + $0x38] sm:$0xff]   ;;  %v710_v48 = vld [vmem:[%s2054_s4 + $0x90] sm:$0xff]  ;;  %v712_v50 = vld [vmem:[%s2054_s4 + $0xa0] sm:$0xff]  ;;  %s296_s15 = scalar_lea.vmem [#allocation2], %s1424_s10 }
  0x1d   : > { %v314_v9 = vpack.c.bf16 %v311_v6, %v311_v6  ;;  %v494_v10 = vsel %vm492_vm0, %v313_v7, 0  ;;  %379 = vperm.xlu0 %1525, %v337_v13   ;;  %384 = vperm.xlu1 %1526, %v338_v14   ;;  %v711_v49 = vld [vmem:[%s2054_s4 + $0x98] sm:$0xff]  ;;  %v713_v51 = vld [vmem:[%s2054_s4 + $0xa8] sm:$0xff]  ;;  %v714_v52 = vld [vmem:[%s2054_s4 + $0xb0] sm:$0xff]  ;;  %s1343_s16 = sshll.u32 %s296_s15, 4  ;;  %s2005_s16 = int_to_ptr.vmem [resolvable:$true] %s1343_s16 }
  0x1e   : > { %v715_v53 = vld [vmem:[%s2054_s4 + $0xb8] sm:$0xff]  ;;  %v716_v54 = vld [vmem:[%s2054_s4 + $0xc0] sm:$0xff]  ;;  %v717_v55 = vld [vmem:[%s2054_s4 + $0xc8] sm:$0xff]  ;;  %s1554_s20 = scalar_lea.vmem %s2005_s16, 256  ;;  %p1561_p1 = scmp.lt.s32.totalorder %s2005_s16, %s1559_s22 }
  0x1f   : > { %1435 = vmatprep.subr.msk.bf16.mxu0 %vm492_vm0, %v314_v9  ;;  %v718_v56 = vld [vmem:[%s2054_s4 + $0xd0] sm:$0xff]  ;;  %v719_v57 = vld [vmem:[%s2054_s4 + $0xd8] sm:$0xff]  ;;  %v720_v58 = vld [vmem:[%s2054_s4 + $0xe0] sm:$0xff]  ;;  %p1555_p12 = scmp.ne.s32.totalorder %s2005_s16, %s1554_s20  ;;  %p1562_p2 = scmp.lt.s32.totalorder %s1560_s23, %s1554_s20 }
  0x20   : > { %500 = vmatpush1.bf16.msra.mxu0 %v494_v10  ;;  %v721_v59 = vld [vmem:[%s2054_s4 + $0xe8] sm:$0xff]  ;;  %v722_v60 = vld [vmem:[%s2054_s4 + $0xf0] sm:$0xff]  ;;  %v723_v61 = vld [vmem:[%s2054_s4 + $0xf8] sm:$0xff] }
  0x21   : > { %389 = vperm.xlu0 %1525, %v339_v15   ;;  %394 = vperm.xlu1 %1526, %v340_v16   ;;  %v1270_v62 = vld [vmem:[%s2056_s6] sm:$0xff]  ;;  %p1556_p13 = pnand %p1555_p12, %p1716_p4  ;;  %p1563_p3 = por %p1562_p2, %p1561_p1 }
  0x23   : > { %1436 = vmatmul.mubr.msk.bf16.vlgmr.msra.gmra.mrb[0].mxu0 %vm467_vm1, %v1528_v12  ;;  %p1557_p0 = pneg %p1556_p13 }
  0x24   : > { %541 = vmatprep.mubr.bf16.mxu0 %v1634_v0 }
  0x25   : > { %399 = vperm.xlu0 %1525, %v341_v18   ;;  %404 = vperm.xlu1 %1526, %v342_v19   ;;  %p1564_p5 = pnand %p1563_p3, %p1557_p0 }
  0x29   : > { %409 = vperm.xlu0 %1525, %v343_v20   ;;  %414 = vperm.xlu1 %1526, %v344_v21  }
  0x2b   : > { %1437 = vmatmul.mubr.msk.bf16.gmra.mrb[4].mxu0 %vm467_vm1, %v1529_v17 }
  0x2c   : > { %551 = vmatprep.mubr.bf16.mxu0 %v1634_v0 }
  0x2d   : > { %419 = vperm.xlu0 %1525, %v345_v23   ;;  %424 = vperm.xlu1 %1526, %v346_v24  }
  0x31   : > { %726 = vperm.xlu0 %1525, %v692_v25   ;;  %731 = vperm.xlu1 %1526, %v693_v26  }
  0x33   : > { %1438 = vmatmul.mubr.msk.bf16.gmra.mrb[8].mxu0 %vm467_vm1, %v1530_v22 }
  0x34   : > { %561 = vmatprep.mubr.bf16.mxu0 %v1634_v0 }
  0x35   : > { %736 = vperm.xlu0 %1525, %v694_v28   ;;  %741 = vperm.xlu1 %1526, %v695_v29  }
  0x39   : > { %746 = vperm.xlu0 %1525, %v696_v30   ;;  %751 = vperm.xlu1 %1526, %v697_v31  }
  0x3b   : > { %1439 = vmatmul.mubr.msk.bf16.gmra.mrb[12].mxu0 %vm467_vm1, %v1531_v27 }
  0x3c   : > { %571 = vmatprep.mubr.bf16.mxu0 %v1634_v0 }
  0x3d   : > { %756 = vperm.xlu0 %1525, %v698_v33   ;;  %761 = vperm.xlu1 %1526, %v699_v34  }
  0x41   : > { %766 = vperm.xlu0 %1525, %v700_v35   ;;  %771 = vperm.xlu1 %1526, %v701_v36  }
  0x43   : > { %1440 = vmatmul.mubr.msk.bf16.gmra.mrb[16].mxu0 %vm467_vm1, %v1532_v32 }
  0x44   : > { %581 = vmatprep.mubr.bf16.mxu0 %v1634_v0 }
  0x45   : > { %776 = vperm.xlu0 %1525, %v702_v38   ;;  %781 = vperm.xlu1 %1526, %v703_v39  }
  0x49   : > { %786 = vperm.xlu0 %1525, %v704_v40   ;;  %791 = vperm.xlu1 %1526, %v705_v41  }
  0x4b   : > { %1441 = vmatmul.mubr.msk.bf16.gmra.mrb[20].mxu0 %vm467_vm1, %v1533_v37 }
  0x4c   : > { %591 = vmatprep.mubr.bf16.mxu0 %v1634_v0 }
  0x4d   : > { %796 = vperm.xlu0 %1525, %v706_v43   ;;  %801 = vperm.xlu1 %1526, %v707_v44  }
  0x51   : > { %806 = vperm.xlu0 %1525, %v708_v45   ;;  %811 = vperm.xlu1 %1526, %v709_v46  }
  0x53   : > { %1442 = vmatmul.mubr.msk.bf16.gmra.mrb[24].mxu0 %vm467_vm1, %v1534_v42 }
  0x54   : > { %601 = vmatprep.mubr.bf16.mxu0 %v1634_v0 }
  0x55   : > { %816 = vperm.xlu0 %1525, %v710_v48   ;;  %821 = vperm.xlu1 %1526, %v711_v49  }
  0x59   : > { %826 = vperm.xlu0 %1525, %v712_v50   ;;  %831 = vperm.xlu1 %1526, %v713_v51  }
  0x5b   : > { %1443 = vmatmul.mubr.msk.bf16.gmra.mrb[28].mxu0 %vm467_vm1, %v1535_v47 }
  0x5d   : > { %836 = vperm.xlu0 %1525, %v714_v52   ;;  %841 = vperm.xlu1 %1526, %v715_v53  }
  0x61   : > { %846 = vperm.xlu0 %1525, %v716_v54   ;;  %851 = vperm.xlu1 %1526, %v717_v55  }
  0x65   : > { %856 = vperm.xlu0 %1525, %v718_v56   ;;  %861 = vperm.xlu1 %1526, %v719_v57  }
  0x69   : > { %866 = vperm.xlu0 %1525, %v720_v58   ;;  %871 = vperm.xlu1 %1526, %v721_v59  }
  0x6d   : > { %876 = vperm.xlu0 %1525, %v722_v60   ;;  %881 = vperm.xlu1 %1526, %v723_v61  }
  0x71   : > { %1273 = vperm.xlu0 %1525, %v1270_v62  }
  0x90   : > { %v350_v63 = vpop.permute.xlu0 %349  ;;  %v360_v9 = vpop.permute.xlu1 %359 }
  0x94   : > { %v355_v4 = vpop.permute.xlu0 %354  ;;  %v365_v20 = vpop.permute.xlu1 %364 }
  0x98   : > { %v370_v31 = vpop.permute.xlu0 %369  ;;  %v375_v36 = vpop.permute.xlu1 %374 }
  0x9c   : > { %v380_v47 = vpop.permute.xlu0 %379  ;;  %v385_v52 = vpop.permute.xlu1 %384 }
  0xf6   : > { %v533_v1 = vpop.f32.mrb[0].mxu0 }
  0xf7   : > { %v534_v2 = vadd.f32 %v533_v1, %v350_v63  ;;  %v535_v3 = vpop.f32.mrb[1].mxu0 }
  0xf8   : > { %v536_v5 = vadd.f32 %v535_v3, %v350_v63  ;;  %v537_v6 = vpop.f32.mrb[2].mxu0  ;;  %v390_v63 = vpop.permute.xlu0 %389 }
  0xf9   : > { %v538_v7 = vadd.f32 %v537_v6, %v355_v4  ;;  %v539_v8 = vpop.f32.mrb[3].mxu0  ;;  %v612_v11 = vmax.f32 %v534_v2, 0.0 }
  0xfa   : > { %v540_v10 = vadd.f32 %v539_v8, %v355_v4  ;;  %v613_v13 = vmax.f32 %v536_v5, 0.0  ;;  %v395_v5 = vpop.permute.xlu1 %394 }
  0xfb   : > { %v614_v12 = vmax.f32 %v538_v7, 0.0 }
  0xfc   : > { %v615_v14 = vmax.f32 %v540_v10, 0.0 }
  0xfd   : > { %v644_v15 = vpack.c.bf16 %v614_v12, %v612_v11 }
  0xfe   : > { %v543_v16 = vpop.f32.mrb[4].mxu0  ;;  %v645_v17 = vpack.c.bf16 %v615_v14, %v613_v13 }
  0xff   : > { %v544_v18 = vadd.f32 %v543_v16, %v360_v9  ;;  %v545_v19 = vpop.f32.mrb[5].mxu0  ;;  %v400_v16 = vpop.permute.xlu0 %399 }
 0x100   : > { %v546_v21 = vadd.f32 %v545_v19, %v360_v9  ;;  %v547_v22 = vpop.f32.mrb[6].mxu0  ;;  %980 = vmatprep.subr.bf16.mxu1 %v645_v17 }
 0x101   : > { %v548_v23 = vadd.f32 %v547_v22, %v365_v20  ;;  %v549_v24 = vpop.f32.mrb[7].mxu0  ;;  %981 = vmatpush1.bf16.msra.mxu1 %v644_v15  ;;  %v616_v26 = vmax.f32 %v544_v18, 0.0 }
 0x102   : > { %v550_v25 = vadd.f32 %v549_v24, %v365_v20  ;;  %v617_v28 = vmax.f32 %v546_v21, 0.0  ;;  %v405_v21 = vpop.permute.xlu1 %404 }
 0x103   : > { %v618_v27 = vmax.f32 %v548_v23, 0.0 }
 0x104   : > { %v619_v29 = vmax.f32 %v550_v25, 0.0 }
 0x105   : > { %v646_v30 = vpack.c.bf16 %v618_v27, %v616_v26 }
 0x106   : > { %v647_v32 = vpack.c.bf16 %v619_v29, %v617_v28  ;;  %v553_v33 = vpop.f32.mrb[8].mxu0 }
 0x107   : > { %v554_v34 = vadd.f32 %v553_v33, %v370_v31  ;;  %v555_v35 = vpop.f32.mrb[9].mxu0 }
 0x108   : > { %v556_v37 = vadd.f32 %v555_v35, %v370_v31  ;;  %v557_v38 = vpop.f32.mrb[10].mxu0  ;;  %982 = vmatprep.subr.bf16.mxu1 %v647_v32  ;;  %v410_v32 = vpop.permute.xlu0 %409 }
 0x109   : > { %v558_v39 = vadd.f32 %v557_v38, %v375_v36  ;;  %v559_v40 = vpop.f32.mrb[11].mxu0  ;;  %983 = vmatpush1.bf16.msra.mxu1 %v646_v30  ;;  %v620_v42 = vmax.f32 %v554_v34, 0.0 }
 0x10a   : > { %v560_v41 = vadd.f32 %v559_v40, %v375_v36  ;;  %v621_v44 = vmax.f32 %v556_v37, 0.0  ;;  %v415_v37 = vpop.permute.xlu1 %414 }
 0x10b   : > { %v622_v43 = vmax.f32 %v558_v39, 0.0 }
 0x10c   : > { %v623_v45 = vmax.f32 %v560_v41, 0.0 }
 0x10d   : > { %v648_v46 = vpack.c.bf16 %v622_v43, %v620_v42 }
 0x10e   : > { %v649_v48 = vpack.c.bf16 %v623_v45, %v621_v44  ;;  %v563_v49 = vpop.f32.mrb[12].mxu0 }
 0x10f   : > { %v564_v50 = vadd.f32 %v563_v49, %v380_v47  ;;  %v565_v51 = vpop.f32.mrb[13].mxu0 }
 0x110   : > { %v566_v53 = vadd.f32 %v565_v51, %v380_v47  ;;  %v567_v54 = vpop.f32.mrb[14].mxu0  ;;  %984 = vmatprep.subr.bf16.mxu1 %v649_v48  ;;  %v420_v48 = vpop.permute.xlu0 %419 }
 0x111   : > { %v568_v55 = vadd.f32 %v567_v54, %v385_v52  ;;  %v569_v56 = vpop.f32.mrb[15].mxu0  ;;  %985 = vmatpush1.bf16.msra.mxu1 %v648_v46  ;;  %v624_v58 = vmax.f32 %v564_v50, 0.0 }
 0x112   : > { %v570_v57 = vadd.f32 %v569_v56, %v385_v52  ;;  %v625_v60 = vmax.f32 %v566_v53, 0.0  ;;  %v425_v53 = vpop.permute.xlu1 %424 }
 0x113   : > { %v626_v59 = vmax.f32 %v568_v55, 0.0 }
 0x114   : > { %v627_v61 = vmax.f32 %v570_v57, 0.0 }
 0x115   : > { %v650_v62 = vpack.c.bf16 %v626_v59, %v624_v58 }
 0x116   : > { %v651_v1 = vpack.c.bf16 %v627_v61, %v625_v60  ;;  %v573_v2 = vpop.f32.mrb[16].mxu0 }
 0x117   : > { %v574_v3 = vadd.f32 %v573_v2, %v390_v63  ;;  %v575_v4 = vpop.f32.mrb[17].mxu0  ;;  %v1536_v2 = vld [vmem:[%s2053_s3] sm:$0xff]  }
 0x118   : > { %v576_v6 = vadd.f32 %v575_v4, %v390_v63  ;;  %v577_v7 = vpop.f32.mrb[18].mxu0  ;;  %986 = vmatprep.subr.bf16.mxu1 %v651_v1  ;;  %v1538_v4 = vld [vmem:[%s2053_s3 + $0x10] sm:$0xff]  }
 0x119   : > { %v578_v8 = vadd.f32 %v577_v7, %v395_v5  ;;  %v579_v9 = vpop.f32.mrb[19].mxu0  ;;  %987 = vmatpush1.bf16.msra.mxu1 %v650_v62  ;;  %v628_v11 = vmax.f32 %v574_v3, 0.0  ;;  %v1537_v3 = vld [vmem:[%s2053_s3 + $0x8] sm:$0xff]  }
 0x11a   : > { %v580_v10 = vadd.f32 %v579_v9, %v395_v5  ;;  %v629_v13 = vmax.f32 %v576_v6, 0.0  ;;  %v1539_v5 = vld [vmem:[%s2053_s3 + $0x18] sm:$0xff]   ;;  %v1540_v6 = vld [vmem:[%s2053_s3 + $0x20] sm:$0xff]   ;;  %v1541_v7 = vld [vmem:[%s2053_s3 + $0x28] sm:$0xff]  }
 0x11b   : > { %v630_v12 = vmax.f32 %v578_v8, 0.0  ;;  %v1542_v8 = vld [vmem:[%s2053_s3 + $0x30] sm:$0xff]   ;;  %v1543_v9 = vld [vmem:[%s2053_s3 + $0x38] sm:$0xff]  }
 0x11c   : > { %v631_v14 = vmax.f32 %v580_v10, 0.0  ;;  %v1544_v10 = vld [vmem:[%s2053_s3 + $0x40] sm:$0xff]  }
 0x11d   : > { %v652_v15 = vpack.c.bf16 %v630_v12, %v628_v11  ;;  %v1545_v11 = vld [vmem:[%s2053_s3 + $0x48] sm:$0xff]   ;;  %v1546_v12 = vld [vmem:[%s2053_s3 + $0x50] sm:$0xff]  }
 0x11e   : > { %v653_v17 = vpack.c.bf16 %v631_v14, %v629_v13  ;;  %v583_v18 = vpop.f32.mrb[20].mxu0  ;;  %v1547_v13 = vld [vmem:[%s2053_s3 + $0x58] sm:$0xff]   ;;  %v1548_v14 = vld [vmem:[%s2053_s3 + $0x60] sm:$0xff]  }
 0x11f   : > { %v584_v19 = vadd.f32 %v583_v18, %v400_v16  ;;  %v585_v20 = vpop.f32.mrb[21].mxu0  ;;  %v727_v18 = vpop.permute.xlu0 %726 }
 0x120   : > { %v586_v22 = vadd.f32 %v585_v20, %v400_v16  ;;  %v587_v23 = vpop.f32.mrb[22].mxu0  ;;  %988 = vmatprep.subr.bf16.mxu1 %v653_v17  ;;  %v1550_v16 = vld [vmem:[%s2053_s3 + $0x70] sm:$0xff]   ;;  %v1551_v17 = vld [vmem:[%s2053_s3 + $0x78] sm:$0xff]  }
 0x121   : > { %v588_v24 = vadd.f32 %v587_v23, %v405_v21  ;;  %v589_v25 = vpop.f32.mrb[23].mxu0  ;;  %989 = vmatpush1.bf16.msra.mxu1 %v652_v15  ;;  %v632_v27 = vmax.f32 %v584_v19, 0.0  ;;  %v1549_v15 = vld [vmem:[%s2053_s3 + $0x68] sm:$0xff]  }
 0x122   : > { %v590_v26 = vadd.f32 %v589_v25, %v405_v21  ;;  %v633_v29 = vmax.f32 %v586_v22, 0.0  ;;  %v732_v22 = vpop.permute.xlu1 %731  ;;  %v1992_v25 = vld [vmem:[%s2055_s5] sm:$0xff] }
 0x123   : > { %v634_v28 = vmax.f32 %v588_v24, 0.0 }
 0x124   : > { %v635_v30 = vmax.f32 %v590_v26, 0.0 }
 0x125   : > { %v654_v31 = vpack.c.bf16 %v634_v28, %v632_v27 }
 0x126   : > { %v655_v33 = vpack.c.bf16 %v635_v30, %v633_v29  ;;  %v593_v34 = vpop.f32.mrb[24].mxu0 }
 0x127   : > { %v594_v35 = vadd.f32 %v593_v34, %v410_v32  ;;  %v595_v36 = vpop.f32.mrb[25].mxu0  ;;  %v737_v34 = vpop.permute.xlu0 %736 }
 0x128   : > { %v596_v38 = vadd.f32 %v595_v36, %v410_v32  ;;  %v597_v39 = vpop.f32.mrb[26].mxu0  ;;  %990 = vmatprep.subr.bf16.mxu1 %v655_v33 }
 0x129   : > { %v598_v40 = vadd.f32 %v597_v39, %v415_v37  ;;  %v599_v41 = vpop.f32.mrb[27].mxu0  ;;  %991 = vmatpush1.bf16.msra.mxu1 %v654_v31  ;;  %v636_v43 = vmax.f32 %v594_v35, 0.0  ;;  %v742_v39 = vpop.permute.xlu1 %741 }
 0x12a   : > { %v600_v42 = vadd.f32 %v599_v41, %v415_v37  ;;  %v637_v45 = vmax.f32 %v596_v38, 0.0 }
 0x12b   : > { %v638_v44 = vmax.f32 %v598_v40, 0.0 }
 0x12c   : > { %v639_v46 = vmax.f32 %v600_v42, 0.0 }
 0x12d   : > { %v656_v47 = vpack.c.bf16 %v638_v44, %v636_v43 }
 0x12e   : > { %v657_v49 = vpack.c.bf16 %v639_v46, %v637_v45  ;;  %v603_v50 = vpop.f32.mrb[28].mxu0 }
 0x12f   : > { %v604_v51 = vadd.f32 %v603_v50, %v420_v48  ;;  %v605_v52 = vpop.f32.mrb[29].mxu0  ;;  %v747_v50 = vpop.permute.xlu0 %746 }
 0x130   : > { %v606_v54 = vadd.f32 %v605_v52, %v420_v48  ;;  %v607_v55 = vpop.f32.mrb[30].mxu0  ;;  %992 = vmatprep.subr.bf16.mxu1 %v657_v49 }
 0x131   : > { %v608_v56 = vadd.f32 %v607_v55, %v425_v53  ;;  %v609_v57 = vpop.f32.mrb[31].mxu0  ;;  %993 = vmatpush1.bf16.msra.mxu1 %v656_v47  ;;  %v640_v59 = vmax.f32 %v604_v51, 0.0  ;;  %v752_v55 = vpop.permute.xlu1 %751 }
 0x132   : > { %v610_v58 = vadd.f32 %v609_v57, %v425_v53  ;;  %v641_v61 = vmax.f32 %v606_v54, 0.0 }
 0x133   : > { %v642_v60 = vmax.f32 %v608_v56, 0.0 }
 0x134   : > { %v643_v62 = vmax.f32 %v610_v58, 0.0 }
 0x135   : > { %v658_v63 = vpack.c.bf16 %v642_v60, %v640_v59 }
 0x136   : > { %v659_v1 = vpack.c.bf16 %v643_v62, %v641_v61 }
 0x138   : > { %994 = vmatprep.subr.bf16.mxu1 %v659_v1 }
 0x139   : > { %995 = vmatpush1.bf16.msra.mxu1 %v658_v63 }
 0x13c   : > { %1013 = vmatmul.mubr.bf16.vlgmr.msra.gmra.mrb[0].mxu1 %v1536_v2 }
 0x13d   : > { %1022 = vmatprep.mubr.bf16.mxu1 %v1634_v0 }
 0x144   : > { %1023 = vmatmul.mubr.bf16.gmra.mrb[4].mxu1 %v1537_v3  ;;  %v757_v3 = vpop.permute.xlu0 %756 }
 0x145   : > { %1032 = vmatprep.mubr.bf16.mxu1 %v1634_v0 }
 0x14c   : > { %1033 = vmatmul.mubr.bf16.gmra.mrb[8].mxu1 %v1538_v4 }
 0x14d   : > { %1042 = vmatprep.mubr.bf16.mxu1 %v1634_v0 }
 0x154   : > { %1043 = vmatmul.mubr.bf16.gmra.mrb[12].mxu1 %v1539_v5 }
 0x155   : > { %1052 = vmatprep.mubr.bf16.mxu1 %v1634_v0 }
 0x15c   : > { %1053 = vmatmul.mubr.bf16.gmra.mrb[16].mxu1 %v1540_v6 }
 0x15d   : > { %1062 = vmatprep.mubr.bf16.mxu1 %v1634_v0 }
 0x164   : > { %1063 = vmatmul.mubr.bf16.gmra.mrb[20].mxu1 %v1541_v7 }
 0x165   : > { %1072 = vmatprep.mubr.bf16.mxu1 %v1634_v0 }
 0x16c   : > { %1073 = vmatmul.mubr.bf16.gmra.mrb[24].mxu1 %v1542_v8  ;;  %v762_v8 = vpop.permute.xlu1 %761 }
 0x16d   : > { %1082 = vmatprep.mubr.bf16.mxu1 %v1634_v0 }
 0x174   : > { %1083 = vmatmul.mubr.bf16.gmra.mrb[28].mxu1 %v1543_v9 }
 0x175   : > { %1092 = vmatprep.mubr.bf16.mxu1 %v1634_v0 }
 0x17c   : > { %1093 = vmatmul.mubr.bf16.gmra.mrb[32].mxu1 %v1544_v10 }
 0x17d   : > { %1102 = vmatprep.mubr.bf16.mxu1 %v1634_v0 }
 0x184   : > { %1103 = vmatmul.mubr.bf16.gmra.mrb[36].mxu1 %v1545_v11 }
 0x185   : > { %1112 = vmatprep.mubr.bf16.mxu1 %v1634_v0 }
 0x18c   : > { %1113 = vmatmul.mubr.bf16.gmra.mrb[40].mxu1 %v1546_v12 }
 0x18d   : > { %1122 = vmatprep.mubr.bf16.mxu1 %v1634_v0 }
 0x194   : > { %1123 = vmatmul.mubr.bf16.gmra.mrb[44].mxu1 %v1547_v13 }
 0x195   : > { %1132 = vmatprep.mubr.bf16.mxu1 %v1634_v0 }
 0x19c   : > { %1133 = vmatmul.mubr.bf16.gmra.mrb[48].mxu1 %v1548_v14 }
 0x19d   : > { %1142 = vmatprep.mubr.bf16.mxu1 %v1634_v0 }
 0x1a4   : > { %1143 = vmatmul.mubr.bf16.gmra.mrb[52].mxu1 %v1549_v15 }
 0x1a5   : > { %1152 = vmatprep.mubr.bf16.mxu1 %v1634_v0 }
 0x1ac   : > { %1153 = vmatmul.mubr.bf16.gmra.mrb[56].mxu1 %v1550_v16 }
 0x1ad   : > { %1162 = vmatprep.mubr.bf16.mxu1 %v1634_v0  ;;  %v1461_v0 = vcombine.high %v1992_v25, %v1992_v25 }
 0x1af   : > { %1315 = vmatprep.mubr.bf16.mxu0 %v1461_v0 }
 0x1b4   : > { %1163 = vmatmul.mubr.bf16.gmra.mrb[60].mxu1 %v1551_v17 }
 0x20f   : > { %v1014_v19 = vpop.f32.mrb[0].mxu1 }
 0x210   : > { %v1015_v20 = vadd.f32 %v1014_v19, %v727_v18  ;;  %v1016_v21 = vpop.f32.mrb[1].mxu1  ;;  %v767_v19 = vpop.permute.xlu0 %766 }
 0x211   : > { %v1017_v23 = vadd.f32 %v1016_v21, %v727_v18  ;;  %v1018_v24 = vpop.f32.mrb[2].mxu1 }
 0x212   : > { %v1019_v26 = vadd.f32 %v1018_v24, %v732_v22  ;;  %v1020_v27 = vpop.f32.mrb[3].mxu1  ;;  %v1173_v29 = vmax.f32 %v1015_v20, 0.0  ;;  %v772_v24 = vpop.permute.xlu1 %771 }
 0x213   : > { %v1021_v28 = vadd.f32 %v1020_v27, %v732_v22  ;;  %v1174_v31 = vmax.f32 %v1017_v23, 0.0 }
 0x214   : > { %v1175_v30 = vmax.f32 %v1019_v26, 0.0 }
 0x215   : > { %v1176_v32 = vmax.f32 %v1021_v28, 0.0 }
 0x216   : > { %v1237_v33 = vpack.c.bf16 %v1175_v30, %v1173_v29 }
 0x217   : > { %v1238_v35 = vpack.c.bf16 %v1176_v32, %v1174_v31  ;;  %v1024_v36 = vpop.f32.mrb[4].mxu1 }
 0x218   : > { %v1025_v37 = vadd.f32 %v1024_v36, %v737_v34  ;;  %v1026_v38 = vpop.f32.mrb[5].mxu1 }
 0x219   : > { %v1027_v40 = vadd.f32 %v1026_v38, %v737_v34  ;;  %v1028_v41 = vpop.f32.mrb[6].mxu1  ;;  %1283 = vmatprep.subr.bf16.mxu0 %v1238_v35  ;;  %v777_v35 = vpop.permute.xlu0 %776 }
 0x21a   : > { %v1029_v42 = vadd.f32 %v1028_v41, %v742_v39  ;;  %v1030_v43 = vpop.f32.mrb[7].mxu1  ;;  %1284 = vmatpush1.bf16.msra.mxu0 %v1237_v33  ;;  %v1177_v45 = vmax.f32 %v1025_v37, 0.0 }
 0x21b   : > { %v1031_v44 = vadd.f32 %v1030_v43, %v742_v39  ;;  %v1178_v47 = vmax.f32 %v1027_v40, 0.0  ;;  %v782_v40 = vpop.permute.xlu1 %781 }
 0x21c   : > { %v1179_v46 = vmax.f32 %v1029_v42, 0.0 }
 0x21d   : > { %v1180_v48 = vmax.f32 %v1031_v44, 0.0 }
 0x21e   : > { %v1239_v49 = vpack.c.bf16 %v1179_v46, %v1177_v45 }
 0x21f   : > { %v1240_v51 = vpack.c.bf16 %v1180_v48, %v1178_v47  ;;  %v1034_v52 = vpop.f32.mrb[8].mxu1 }
 0x220   : > { %v1035_v53 = vadd.f32 %v1034_v52, %v747_v50  ;;  %v1036_v54 = vpop.f32.mrb[9].mxu1 }
 0x221   : > { %v1037_v56 = vadd.f32 %v1036_v54, %v747_v50  ;;  %v1038_v57 = vpop.f32.mrb[10].mxu1  ;;  %1285 = vmatprep.subr.bf16.mxu0 %v1240_v51  ;;  %v787_v51 = vpop.permute.xlu0 %786 }
 0x222   : > { %v1039_v58 = vadd.f32 %v1038_v57, %v752_v55  ;;  %v1040_v59 = vpop.f32.mrb[11].mxu1  ;;  %1286 = vmatpush1.bf16.msra.mxu0 %v1239_v49  ;;  %v1181_v61 = vmax.f32 %v1035_v53, 0.0 }
 0x223   : > { %v1041_v60 = vadd.f32 %v1040_v59, %v752_v55  ;;  %v1182_v63 = vmax.f32 %v1037_v56, 0.0  ;;  %v792_v56 = vpop.permute.xlu1 %791 }
 0x224   : > { %v1183_v62 = vmax.f32 %v1039_v58, 0.0 }
 0x225   : > { %v1184_v1 = vmax.f32 %v1041_v60, 0.0 }
 0x226   : > { %v1241_v2 = vpack.c.bf16 %v1183_v62, %v1181_v61 }
 0x227   : > { %v1242_v4 = vpack.c.bf16 %v1184_v1, %v1182_v63  ;;  %v1044_v5 = vpop.f32.mrb[12].mxu1 }
 0x228   : > { %v1045_v6 = vadd.f32 %v1044_v5, %v757_v3  ;;  %v1046_v7 = vpop.f32.mrb[13].mxu1 }
 0x229   : > { %v1047_v9 = vadd.f32 %v1046_v7, %v757_v3  ;;  %v1048_v10 = vpop.f32.mrb[14].mxu1  ;;  %1287 = vmatprep.subr.bf16.mxu0 %v1242_v4  ;;  %v797_v4 = vpop.permute.xlu0 %796 }
 0x22a   : > { %v1049_v11 = vadd.f32 %v1048_v10, %v762_v8  ;;  %v1050_v12 = vpop.f32.mrb[15].mxu1  ;;  %1288 = vmatpush1.bf16.msra.mxu0 %v1241_v2  ;;  %v1185_v14 = vmax.f32 %v1045_v6, 0.0 }
 0x22b   : > { %v1051_v13 = vadd.f32 %v1050_v12, %v762_v8  ;;  %v1186_v16 = vmax.f32 %v1047_v9, 0.0  ;;  %v802_v9 = vpop.permute.xlu1 %801 }
 0x22c   : > { %v1187_v15 = vmax.f32 %v1049_v11, 0.0 }
 0x22d   : > { %v1188_v17 = vmax.f32 %v1051_v13, 0.0 }
 0x22e   : > { %v1243_v18 = vpack.c.bf16 %v1187_v15, %v1185_v14 }
 0x22f   : > { %v1244_v20 = vpack.c.bf16 %v1188_v17, %v1186_v16  ;;  %v1054_v21 = vpop.f32.mrb[16].mxu1 }
 0x230   : > { %v1055_v22 = vadd.f32 %v1054_v21, %v767_v19  ;;  %v1056_v23 = vpop.f32.mrb[17].mxu1 }
 0x231   : > { %v1057_v26 = vadd.f32 %v1056_v23, %v767_v19  ;;  %v1058_v27 = vpop.f32.mrb[18].mxu1  ;;  %1289 = vmatprep.subr.bf16.mxu0 %v1244_v20  ;;  %v807_v20 = vpop.permute.xlu0 %806 }
 0x232   : > { %v1059_v0 = vadd.f32 %v1058_v27, %v772_v24  ;;  %v1060_v28 = vpop.f32.mrb[19].mxu1  ;;  %1290 = vmatpush1.bf16.msra.mxu0 %v1243_v18  ;;  %v1189_v30 = vmax.f32 %v1055_v22, 0.0 }
 0x233   : > { %v1061_v29 = vadd.f32 %v1060_v28, %v772_v24  ;;  %v1190_v32 = vmax.f32 %v1057_v26, 0.0  ;;  %v812_v26 = vpop.permute.xlu1 %811 }
 0x234   : > { %v1191_v31 = vmax.f32 %v1059_v0, 0.0 }
 0x235   : > { %v1192_v33 = vmax.f32 %v1061_v29, 0.0 }
 0x236   : > { %v1245_v34 = vpack.c.bf16 %v1191_v31, %v1189_v30 }
 0x237   : > { %v1246_v36 = vpack.c.bf16 %v1192_v33, %v1190_v32  ;;  %v1064_v37 = vpop.f32.mrb[20].mxu1 }
 0x238   : > { %v1065_v38 = vadd.f32 %v1064_v37, %v777_v35  ;;  %v1066_v39 = vpop.f32.mrb[21].mxu1 }
 0x239   : > { %v1067_v41 = vadd.f32 %v1066_v39, %v777_v35  ;;  %v1068_v42 = vpop.f32.mrb[22].mxu1  ;;  %1291 = vmatprep.subr.bf16.mxu0 %v1246_v36  ;;  %v817_v36 = vpop.permute.xlu0 %816 }
 0x23a   : > { %v1069_v43 = vadd.f32 %v1068_v42, %v782_v40  ;;  %v1070_v44 = vpop.f32.mrb[23].mxu1  ;;  %1292 = vmatpush1.bf16.msra.mxu0 %v1245_v34  ;;  %v1193_v46 = vmax.f32 %v1065_v38, 0.0 }
 0x23b   : > { %v1071_v45 = vadd.f32 %v1070_v44, %v782_v40  ;;  %v1194_v48 = vmax.f32 %v1067_v41, 0.0  ;;  %v822_v41 = vpop.permute.xlu1 %821 }
 0x23c   : > { %v1195_v47 = vmax.f32 %v1069_v43, 0.0 }
 0x23d   : > { %v1196_v49 = vmax.f32 %v1071_v45, 0.0 }
 0x23e   : > { %v1247_v50 = vpack.c.bf16 %v1195_v47, %v1193_v46 }
 0x23f   : > { %v1248_v52 = vpack.c.bf16 %v1196_v49, %v1194_v48  ;;  %v1074_v53 = vpop.f32.mrb[24].mxu1 }
 0x240   : > { %v1075_v54 = vadd.f32 %v1074_v53, %v787_v51  ;;  %v1076_v55 = vpop.f32.mrb[25].mxu1 }
 0x241   : > { %v1077_v57 = vadd.f32 %v1076_v55, %v787_v51  ;;  %v1078_v58 = vpop.f32.mrb[26].mxu1  ;;  %1293 = vmatprep.subr.bf16.mxu0 %v1248_v52  ;;  %v827_v52 = vpop.permute.xlu0 %826 }
 0x242   : > { %v1079_v59 = vadd.f32 %v1078_v58, %v792_v56  ;;  %v1080_v60 = vpop.f32.mrb[27].mxu1  ;;  %1294 = vmatpush1.bf16.msra.mxu0 %v1247_v50  ;;  %v1197_v62 = vmax.f32 %v1075_v54, 0.0 }
 0x243   : > { %v1081_v61 = vadd.f32 %v1080_v60, %v792_v56  ;;  %v1198_v1 = vmax.f32 %v1077_v57, 0.0  ;;  %v832_v57 = vpop.permute.xlu1 %831 }
 0x244   : > { %v1199_v63 = vmax.f32 %v1079_v59, 0.0 }
 0x245   : > { %v1200_v2 = vmax.f32 %v1081_v61, 0.0 }
 0x246   : > { %v1249_v3 = vpack.c.bf16 %v1199_v63, %v1197_v62 }
 0x247   : > { %v1250_v5 = vpack.c.bf16 %v1200_v2, %v1198_v1  ;;  %v1084_v6 = vpop.f32.mrb[28].mxu1 }
 0x248   : > { %v1085_v7 = vadd.f32 %v1084_v6, %v797_v4  ;;  %v1086_v8 = vpop.f32.mrb[29].mxu1 }
 0x249   : > { %v1087_v10 = vadd.f32 %v1086_v8, %v797_v4  ;;  %v1088_v11 = vpop.f32.mrb[30].mxu1  ;;  %1295 = vmatprep.subr.bf16.mxu0 %v1250_v5  ;;  %v837_v5 = vpop.permute.xlu0 %836 }
 0x24a   : > { %v1089_v12 = vadd.f32 %v1088_v11, %v802_v9  ;;  %v1090_v13 = vpop.f32.mrb[31].mxu1  ;;  %1296 = vmatpush1.bf16.msra.mxu0 %v1249_v3  ;;  %v1201_v15 = vmax.f32 %v1085_v7, 0.0 }
 0x24b   : > { %v1091_v14 = vadd.f32 %v1090_v13, %v802_v9  ;;  %v1202_v17 = vmax.f32 %v1087_v10, 0.0  ;;  %v842_v10 = vpop.permute.xlu1 %841 }
 0x24c   : > { %v1203_v16 = vmax.f32 %v1089_v12, 0.0 }
 0x24d   : > { %v1204_v18 = vmax.f32 %v1091_v14, 0.0 }
 0x24e   : > { %v1251_v19 = vpack.c.bf16 %v1203_v16, %v1201_v15 }
 0x24f   : > { %v1252_v21 = vpack.c.bf16 %v1204_v18, %v1202_v17  ;;  %v1094_v22 = vpop.f32.mrb[32].mxu1 }
 0x250   : > { %v1095_v23 = vadd.f32 %v1094_v22, %v807_v20  ;;  %v1096_v24 = vpop.f32.mrb[33].mxu1 }
 0x251   : > { %v1097_v27 = vadd.f32 %v1096_v24, %v807_v20  ;;  %v1098_v0 = vpop.f32.mrb[34].mxu1  ;;  %1297 = vmatprep.subr.bf16.mxu0 %v1252_v21  ;;  %v847_v21 = vpop.permute.xlu0 %846 }
 0x252   : > { %v1099_v28 = vadd.f32 %v1098_v0, %v812_v26  ;;  %v1100_v29 = vpop.f32.mrb[35].mxu1  ;;  %1298 = vmatpush1.bf16.msra.mxu0 %v1251_v19  ;;  %v1205_v31 = vmax.f32 %v1095_v23, 0.0 }
 0x253   : > { %v1101_v30 = vadd.f32 %v1100_v29, %v812_v26  ;;  %v1206_v33 = vmax.f32 %v1097_v27, 0.0  ;;  %v852_v27 = vpop.permute.xlu1 %851 }
 0x254   : > { %v1207_v32 = vmax.f32 %v1099_v28, 0.0 }
 0x255   : > { %v1208_v34 = vmax.f32 %v1101_v30, 0.0 }
 0x256   : > { %v1253_v35 = vpack.c.bf16 %v1207_v32, %v1205_v31 }
 0x257   : > { %v1254_v37 = vpack.c.bf16 %v1208_v34, %v1206_v33  ;;  %v1104_v38 = vpop.f32.mrb[36].mxu1 }
 0x258   : > { %v1105_v39 = vadd.f32 %v1104_v38, %v817_v36  ;;  %v1106_v40 = vpop.f32.mrb[37].mxu1 }
 0x259   : > { %v1107_v42 = vadd.f32 %v1106_v40, %v817_v36  ;;  %v1108_v43 = vpop.f32.mrb[38].mxu1  ;;  %1299 = vmatprep.subr.bf16.mxu0 %v1254_v37  ;;  %v857_v37 = vpop.permute.xlu0 %856 }
 0x25a   : > { %v1109_v44 = vadd.f32 %v1108_v43, %v822_v41  ;;  %v1110_v45 = vpop.f32.mrb[39].mxu1  ;;  %1300 = vmatpush1.bf16.msra.mxu0 %v1253_v35  ;;  %v1209_v47 = vmax.f32 %v1105_v39, 0.0 }
 0x25b   : > { %v1111_v46 = vadd.f32 %v1110_v45, %v822_v41  ;;  %v1210_v49 = vmax.f32 %v1107_v42, 0.0  ;;  %v862_v42 = vpop.permute.xlu1 %861 }
 0x25c   : > { %v1211_v48 = vmax.f32 %v1109_v44, 0.0 }
 0x25d   : > { %v1212_v50 = vmax.f32 %v1111_v46, 0.0 }
 0x25e   : > { %v1255_v51 = vpack.c.bf16 %v1211_v48, %v1209_v47 }
 0x25f   : > { %v1256_v53 = vpack.c.bf16 %v1212_v50, %v1210_v49  ;;  %v1114_v54 = vpop.f32.mrb[40].mxu1 }
 0x260   : > { %v1115_v55 = vadd.f32 %v1114_v54, %v827_v52  ;;  %v1116_v56 = vpop.f32.mrb[41].mxu1 }
 0x261   : > { %v1117_v58 = vadd.f32 %v1116_v56, %v827_v52  ;;  %v1118_v59 = vpop.f32.mrb[42].mxu1  ;;  %1301 = vmatprep.subr.bf16.mxu0 %v1256_v53  ;;  %v867_v53 = vpop.permute.xlu0 %866 }
 0x262   : > { %v1119_v60 = vadd.f32 %v1118_v59, %v832_v57  ;;  %v1120_v61 = vpop.f32.mrb[43].mxu1  ;;  %1302 = vmatpush1.bf16.msra.mxu0 %v1255_v51  ;;  %v1213_v63 = vmax.f32 %v1115_v55, 0.0 }
 0x263   : > { %v1121_v62 = vadd.f32 %v1120_v61, %v832_v57  ;;  %v1214_v2 = vmax.f32 %v1117_v58, 0.0  ;;  %v872_v58 = vpop.permute.xlu1 %871 }
 0x264   : > { %v1215_v1 = vmax.f32 %v1119_v60, 0.0 }
 0x265   : > { %v1216_v3 = vmax.f32 %v1121_v62, 0.0 }
 0x266   : > { %v1257_v4 = vpack.c.bf16 %v1215_v1, %v1213_v63 }
 0x267   : > { %v1258_v6 = vpack.c.bf16 %v1216_v3, %v1214_v2  ;;  %v1124_v7 = vpop.f32.mrb[44].mxu1 }
 0x268   : > { %v1125_v8 = vadd.f32 %v1124_v7, %v837_v5  ;;  %v1126_v9 = vpop.f32.mrb[45].mxu1 }
 0x269   : > { %v1127_v11 = vadd.f32 %v1126_v9, %v837_v5  ;;  %v1128_v12 = vpop.f32.mrb[46].mxu1  ;;  %1303 = vmatprep.subr.bf16.mxu0 %v1258_v6  ;;  %v877_v6 = vpop.permute.xlu0 %876 }
 0x26a   : > { %v1129_v13 = vadd.f32 %v1128_v12, %v842_v10  ;;  %v1130_v14 = vpop.f32.mrb[47].mxu1  ;;  %1304 = vmatpush1.bf16.msra.mxu0 %v1257_v4  ;;  %v1217_v16 = vmax.f32 %v1125_v8, 0.0 }
 0x26b   : > { %v1131_v15 = vadd.f32 %v1130_v14, %v842_v10  ;;  %v1218_v18 = vmax.f32 %v1127_v11, 0.0  ;;  %v882_v11 = vpop.permute.xlu1 %881 }
 0x26c   : > { %v1219_v17 = vmax.f32 %v1129_v13, 0.0 }
 0x26d   : > { %v1220_v19 = vmax.f32 %v1131_v15, 0.0 }
 0x26e   : > { %v1259_v20 = vpack.c.bf16 %v1219_v17, %v1217_v16 }
 0x26f   : > { %v1260_v22 = vpack.c.bf16 %v1220_v19, %v1218_v18  ;;  %v1134_v23 = vpop.f32.mrb[48].mxu1 }
 0x270   : > { %v1135_v24 = vadd.f32 %v1134_v23, %v847_v21  ;;  %v1136_v26 = vpop.f32.mrb[49].mxu1  ;;  %v1460_v23 = vcombine.low %v1992_v25, %v1992_v25 }
 0x271   : > { %v1137_v0 = vadd.f32 %v1136_v26, %v847_v21  ;;  %v1138_v28 = vpop.f32.mrb[50].mxu1  ;;  %1305 = vmatprep.subr.bf16.mxu0 %v1260_v22 }
 0x272   : > { %v1139_v29 = vadd.f32 %v1138_v28, %v852_v27  ;;  %v1140_v30 = vpop.f32.mrb[51].mxu1  ;;  %1306 = vmatpush1.bf16.msra.mxu0 %v1259_v20  ;;  %v1221_v32 = vmax.f32 %v1135_v24, 0.0  ;;  %v1274_v24 = vpop.permute.xlu0 %1273 }
 0x273   : > { %v1141_v31 = vadd.f32 %v1140_v30, %v852_v27  ;;  %v1222_v34 = vmax.f32 %v1137_v0, 0.0 }
 0x274   : > { %v1223_v33 = vmax.f32 %v1139_v29, 0.0 }
 0x275   : > { %v1224_v35 = vmax.f32 %v1141_v31, 0.0 }
 0x276   : > { %v1261_v36 = vpack.c.bf16 %v1223_v33, %v1221_v32 }
 0x277   : > { %v1262_v38 = vpack.c.bf16 %v1224_v35, %v1222_v34  ;;  %v1144_v39 = vpop.f32.mrb[52].mxu1 }
 0x278   : > { %v1145_v40 = vadd.f32 %v1144_v39, %v857_v37  ;;  %v1146_v41 = vpop.f32.mrb[53].mxu1 }
 0x279   : > { %v1147_v43 = vadd.f32 %v1146_v41, %v857_v37  ;;  %v1148_v44 = vpop.f32.mrb[54].mxu1  ;;  %1307 = vmatprep.subr.bf16.mxu0 %v1262_v38 }
 0x27a   : > { %v1149_v45 = vadd.f32 %v1148_v44, %v862_v42  ;;  %v1150_v46 = vpop.f32.mrb[55].mxu1  ;;  %1308 = vmatpush1.bf16.msra.mxu0 %v1261_v36  ;;  %v1225_v48 = vmax.f32 %v1145_v40, 0.0 }
 0x27b   : > { %v1151_v47 = vadd.f32 %v1150_v46, %v862_v42  ;;  %v1226_v50 = vmax.f32 %v1147_v43, 0.0 }
 0x27c   : > { %v1227_v49 = vmax.f32 %v1149_v45, 0.0 }
 0x27d   : > { %v1228_v51 = vmax.f32 %v1151_v47, 0.0 }
 0x27e   : > { %v1263_v52 = vpack.c.bf16 %v1227_v49, %v1225_v48 }
 0x27f   : > { %v1264_v54 = vpack.c.bf16 %v1228_v51, %v1226_v50  ;;  %v1154_v55 = vpop.f32.mrb[56].mxu1 }
 0x280   : > { %v1155_v56 = vadd.f32 %v1154_v55, %v867_v53  ;;  %v1156_v57 = vpop.f32.mrb[57].mxu1 }
 0x281   : > { %v1157_v59 = vadd.f32 %v1156_v57, %v867_v53  ;;  %v1158_v60 = vpop.f32.mrb[58].mxu1  ;;  %1309 = vmatprep.subr.bf16.mxu0 %v1264_v54 }
 0x282   : > { %v1159_v61 = vadd.f32 %v1158_v60, %v872_v58  ;;  %v1160_v62 = vpop.f32.mrb[59].mxu1  ;;  %1310 = vmatpush1.bf16.msra.mxu0 %v1263_v52  ;;  %v1229_v1 = vmax.f32 %v1155_v56, 0.0 }
 0x283   : > { %v1161_v63 = vadd.f32 %v1160_v62, %v872_v58  ;;  %v1230_v3 = vmax.f32 %v1157_v59, 0.0 }
 0x284   : > { %v1231_v2 = vmax.f32 %v1159_v61, 0.0 }
 0x285   : > { %v1232_v4 = vmax.f32 %v1161_v63, 0.0 }
 0x286   : > { %v1265_v5 = vpack.c.bf16 %v1231_v2, %v1229_v1 }
 0x287   : > { %v1266_v7 = vpack.c.bf16 %v1232_v4, %v1230_v3  ;;  %v1164_v8 = vpop.f32.mrb[60].mxu1 }
 0x288   : > { %v1165_v9 = vadd.f32 %v1164_v8, %v877_v6  ;;  %v1166_v10 = vpop.f32.mrb[61].mxu1 }
 0x289   : > { %v1167_v12 = vadd.f32 %v1166_v10, %v877_v6  ;;  %v1168_v13 = vpop.f32.mrb[62].mxu1  ;;  %1311 = vmatprep.subr.bf16.mxu0 %v1266_v7 }
 0x28a   : > { %v1169_v14 = vadd.f32 %v1168_v13, %v882_v11  ;;  %v1170_v15 = vpop.f32.mrb[63].mxu1  ;;  %1312 = vmatpush1.bf16.msra.mxu0 %v1265_v5  ;;  %v1233_v17 = vmax.f32 %v1165_v9, 0.0 }
 0x28b   : > { %v1171_v16 = vadd.f32 %v1170_v15, %v882_v11  ;;  %v1234_v19 = vmax.f32 %v1167_v12, 0.0 }
 0x28c   : > { %v1235_v18 = vmax.f32 %v1169_v14, 0.0 }
 0x28d   : > { %v1236_v20 = vmax.f32 %v1171_v16, 0.0 }
 0x28e   : > { %v1267_v21 = vpack.c.bf16 %v1235_v18, %v1233_v17 }
 0x28f   : > { %v1268_v22 = vpack.c.bf16 %v1236_v20, %v1234_v19 }
 0x291   : > { %1313 = vmatprep.subr.bf16.mxu0 %v1268_v22 }
 0x292   : > { %1314 = vmatpush1.bf16.msra.mxu0 %v1267_v21 }
 0x295   : > { %1316 = vmatmul.mubr.bf16.vlgmr.msra.gmra.mrb[32].mxu0 %v1460_v23 }
 0x368   : > { %v1317_v26 = vpop.f32.mrb[32].mxu0 }
 0x369   : > { %v1318_v27 = vadd.f32 %v1317_v26, %v1274_v24  ;;  %v1319_v0 = vpop.f32.mrb[33].mxu0 }
 0x36a   : > { %v1320_v28 = vadd.f32 %v1319_v0, %v1274_v24  ;;  %v1321_v29 = vpop.f32.mrb[34].mxu0 }
 0x36b   : > { %1324 = vst [vmem:[%s296_s15] sm:$0xff] %v1318_v27  ;;  %v1322_v25 = vpop.f32.mrb[35].mxu0 }
 0x36c   : > { %1325 = vst [vmem:[%s296_s15 + $0x8] sm:$0xff] %v1320_v28 }
 0x36d   : > { %1567 = shalt.err (!%p1564_p5)
}
 0x36e   : > { %s1568_s30 = scalar_lea.hbm %s2003_s18, 256  ;;  %s1572_s12 = scalar_lea.hbm %s2057_s7, 512 }
 0x36f   : > { %p1569_p6 = scmp.ne.s32.totalorder %s2003_s18, %s1568_s30  ;;  %p1573_p10 = scmp.lt.u32.totalorder %s2003_s18, %s2057_s7 }
 0x370   : > { %p1574_p11 = scmp.lt.u32.totalorder %s1572_s12, %s1568_s30  ;;  %p1576_p13 = scmp.lt.u32.totalorder %s1568_s30, %s2003_s18 }
 0x371   : > { %p1570_p7 = pnand %p1569_p6, %p1716_p4 }
 0x372   : > { %p1575_p12 = por %p1574_p11, %p1573_p10 }
 0x373   : > { %p1571_p9 = pneg %p1570_p7 }
 0x374   : > { %p1577_p0 = por %p1576_p13, %p1575_p12 }
 0x376   : > { %p1578_p1 = pnand %p1577_p0, %p1571_p9 }
 0x378   : > { %1581 = shalt.err (!%p1578_p1)
}
 0x379   : > { %1469 = dma.vmem_to_hbm [thread:$0]  (%p1716_p4), %s2005_s16, 256, %s2003_s18, %s1327_s27  }
 0x37a PF: > { %p1475_p2 = scmp.ge.s32.totalorder %s1632_s29, 2  ;;  %s1355_s19 = sand.u32 1, %s1612_s24  }
 0x37b   : > { %s1356_s20 = scalar_lea.sflag [#allocation3], %s1355_s19 }
 0x37c   : > { %p1472_p3 = pnand %p1475_p2, %p1723_p8 }
 0x37e   : > { %1607 = dma.done.wait (!%p1472_p3), %s1356_s20, 256  }
 0x37f   : > { %1609 = vsyncadd (!%p1472_p3), %s1356_s20, 4294967040  ;;  %s20_s29 = sadd.s32 1, %s1632_s29   ;;  %s2060_s24 = smov %s1616_s25 }
 0x380   : > { %p17_p5 = scmp.ge.s32.totalorder %s20_s29, 4   ;;  %s2061_s25 = smov %s1620_s26 }
 0x381   : > { %s2062_s26 = smov %s1729_s14  ;;  %s2063_s27 = smov %s1628_s28 }
 0x382   : > { %s2064_s28 = smov %s2066_s9  ;;  %19 = sbr.rel (!%p17_p5) target bundleno = 4 (0x4), region = 83 }
 0x389   :  { %1361 = vsyncpa [#allocation3], 1 }
 0x38a   :  { %1363 = vsyncpa [#allocation3 + $0x1], 1 }

</bundles_post_ra>
